<compile_context>
chip_gen: v7x
topology: tpu7x:2x2x1
jax: 0.10.0
libtpu: 0.0.40
codegen_flags: <defaults>
</compile_context>

<pallas_src>
import functools
import itertools

import jax
import jax.numpy as jnp
from jax.experimental import pallas as pl
from jax.experimental.pallas import tpu as pltpu


# ----------------------------------------------------------------------------
# Kernel body: one batch element per invocation.
#   x_ref     : (n, dim)        f32   (batch dim squeezed by BlockSpec)
#   ln_ref    : (2, dim)        f32   row0 = gamma, row1 = beta
#   wqkv_ref  : (dim, h)        bf16  fused qkv weight, scale folded into q cols
#   bqkv_ref  : (1, h)          f32   fused qkv bias, scale folded into q part
#   bias_ref  : (H, n, n)       f32   gathered attention-bias table
#   wproj_ref : (H*d, dim)      bf16
#   bproj_ref : (1, dim)        f32
#   o_ref     : (n, dim)        f32
# ----------------------------------------------------------------------------
def attention_kernel(x_ref, ln_ref, wqkv_ref, bqkv_ref, bias_ref, wproj_ref,
                     bproj_ref, o_ref, *, num_heads, key_dim, d):
    x = x_ref[...]                                       # (n, dim) f32
    per_head = 2 * key_dim + d

    # --- LayerNorm (eps=1e-5, torch default), all f32 on VPU/EUP ---
    mean = jnp.mean(x, axis=-1, keepdims=True)
    var = jnp.mean((x - mean) ** 2, axis=-1, keepdims=True)
    xn = (x - mean) * jax.lax.rsqrt(var + 1e-5)
    xn = xn * ln_ref[0:1, :] + ln_ref[1:2, :]            # (n, dim)

    # --- fused qkv projection: ONE MXU push (n,dim)@(dim,h), f32 accumulate ---
    qkv = jnp.dot(xn.astype(jnp.bfloat16), wqkv_ref[...],
                  preferred_element_type=jnp.float32) + bqkv_ref[...]   # (n, h)

    # --- per-head attention (H is small & static); scale already in q ---
    outs = []
    for hh in range(num_heads):
        off = hh * per_head
        q = qkv[:, off:off + key_dim]                    # (n, kd) f32
        k = qkv[:, off + key_dim:off + 2 * key_dim]      # (n, kd) f32
        v = qkv[:, off + 2 * key_dim:off + per_head]     # (n, d)  f32

        s = jnp.dot(q.astype(jnp.bfloat16), k.astype(jnp.bfloat16).T,
                    preferred_element_type=jnp.float32) + bias_ref[hh]  # (n, n)

        # numerically-stable softmax, f32
        s = s - jnp.max(s, axis=-1, keepdims=True)
        p = jnp.exp(s)
        p = p / jnp.sum(p, axis=-1, keepdims=True)

        outs.append(jnp.dot(p.astype(jnp.bfloat16), v.astype(jnp.bfloat16),
                            preferred_element_type=jnp.float32))        # (n, d)

    # --- head merge folded into ONE proj matmul: (n, H*d) @ (H*d, dim) ---
    out = jnp.concatenate(outs, axis=-1)                 # (n, H*d) f32
    proj = jnp.dot(out.astype(jnp.bfloat16), wproj_ref[...],
                   preferred_element_type=jnp.float32)   # (n, dim)
    o_ref[...] = proj + bproj_ref[...]


# ----------------------------------------------------------------------------
# One-time parameter preparation (weights only; call once, outside the
# per-forward path).
# ----------------------------------------------------------------------------
def prepare_params(ln_w, ln_b, wqkv, bqkv, attention_biases, idxs, wproj,
                   bproj, *, num_heads, key_dim, d, scale):
    dim = ln_w.shape[0]
    per_head = 2 * key_dim + d
    h = num_heads * per_head

    # scale folded into the q columns of the fused qkv weight/bias.
    col_scale = jnp.concatenate([jnp.full((key_dim,), scale, jnp.float32),
                                 jnp.ones((key_dim,), jnp.float32),
                                 jnp.ones((d,), jnp.float32)])
    col_scale = jnp.tile(col_scale, num_heads)                      # (h,)
    w_fused = (wqkv.T * col_scale[None, :]).astype(jnp.bfloat16)    # (dim, h)
    b_fused = (bqkv * col_scale).reshape(1, h).astype(jnp.float32)  # (1, h)

    ln = jnp.stack([ln_w, ln_b], axis=0).astype(jnp.float32)        # (2, dim)
    bias = attention_biases[:, idxs].astype(jnp.float32)            # (H, n, n)
    wproj_t = wproj.T.astype(jnp.bfloat16)                          # (H*d, dim)
    bproj2 = bproj.reshape(1, dim).astype(jnp.float32)              # (1, dim)
    return ln, w_fused, b_fused, bias, wproj_t, bproj2


# ----------------------------------------------------------------------------
# Per-call forward (jitted): just the pallas_call.
# ----------------------------------------------------------------------------
@functools.partial(jax.jit, static_argnames=("num_heads", "key_dim", "d"))
def attention_forward(x, ln, w_fused, b_fused, bias, wproj_t, bproj2, *,
                      num_heads, key_dim, d):
    B, n, dim = x.shape
    h = w_fused.shape[1]
    dh = num_heads * d

    kernel = functools.partial(attention_kernel, num_heads=num_heads,
                               key_dim=key_dim, d=d)
    out = pl.pallas_call(
        kernel,
        out_shape=jax.ShapeDtypeStruct((B, n, dim), jnp.float32),
        grid=(B,),
        in_specs=[
            pl.BlockSpec((None, n, dim), lambda b: (b, 0, 0)),       # x (per batch)
            pl.BlockSpec((2, dim), lambda b: (0, 0)),                # ln params
            pl.BlockSpec((dim, h), lambda b: (0, 0)),                # fused qkv W
            pl.BlockSpec((1, h), lambda b: (0, 0)),                  # fused qkv b
            pl.BlockSpec((num_heads, n, n), lambda b: (0, 0, 0)),    # bias table
            pl.BlockSpec((dh, dim), lambda b: (0, 0)),               # proj W
            pl.BlockSpec((1, dim), lambda b: (0, 0)),                # proj b
        ],
        out_specs=pl.BlockSpec((None, n, dim), lambda b: (b, 0, 0)),
        compiler_params=pltpu.CompilerParams(
            dimension_semantics=("parallel",)),                     # megacore on v7x
    )(x, ln, w_fused, b_fused, bias, wproj_t, bproj2)
    return out


# ----------------------------------------------------------------------------
# Pure-JAX f32 reference (mirrors the PyTorch forward) for correctness check.
# ----------------------------------------------------------------------------
def ref_forward(x, ln_w, ln_b, wqkv, bqkv, attention_biases, idxs, wproj,
                bproj, *, num_heads, key_dim, d, scale):
    b, n, dim = x.shape
    mean = x.mean(-1, keepdims=True)
    var = ((x - mean) ** 2).mean(-1, keepdims=True)
    xn = (x - mean) / jnp.sqrt(var + 1e-5) * ln_w + ln_b
    qkv = xn @ wqkv.T + bqkv
    qkv = qkv.reshape(b, n, num_heads, 2 * key_dim + d)
    q = qkv[..., :key_dim].transpose(0, 2, 1, 3)
    k = qkv[..., key_dim:2 * key_dim].transpose(0, 2, 1, 3)
    v = qkv[..., 2 * key_dim:].transpose(0, 2, 1, 3)
    bias = attention_biases[:, idxs]
    attn = jnp.einsum('bhqe,bhke->bhqk', q, k) * scale + bias[None]
    attn = jax.nn.softmax(attn, axis=-1)
    out = jnp.einsum('bhqk,bhkd->bhqd', attn, v)
    out = out.transpose(0, 2, 1, 3).reshape(b, n, num_heads * d)
    return out @ wproj.T + bproj


if __name__ == "__main__":
    # --- module hyperparameters (small) ---
    dim = 32
    key_dim = 8
    num_heads = 2
    attn_ratio = 4
    resolution = (4, 4)

    d = int(attn_ratio * key_dim)          # 32
    dh = d * num_heads                     # 64
    nh_kd = key_dim * num_heads            # 16
    h = dh + nh_kd * 2                     # 96
    scale = key_dim ** (-0.5)

    n = resolution[0] * resolution[1]      # 16 tokens
    batch = 2

    # --- attention-bias index table (same construction as the PyTorch code) ---
    points = list(itertools.product(range(resolution[0]), range(resolution[1])))
    attention_offsets = {}
    idxs = []
    for p1 in points:
        for p2 in points:
            offset = (abs(p1[0] - p2[0]), abs(p1[1] - p2[1]))
            if offset not in attention_offsets:
                attention_offsets[offset] = len(attention_offsets)
            idxs.append(attention_offsets[offset])
    num_offsets = len(attention_offsets)
    idxs = jnp.asarray(idxs, dtype=jnp.int32).reshape(n, n)

    # --- deterministic parameter init (torch layouts) ---
    key = jax.random.PRNGKey(0)
    ks = jax.random.split(key, 8)
    wqkv = jax.random.normal(ks[0], (h, dim), jnp.float32) * 0.05    # (out, in)
    bqkv = jax.random.normal(ks[1], (h,), jnp.float32) * 0.05
    wproj = jax.random.normal(ks[2], (dim, dh), jnp.float32) * 0.05  # (out, in)
    bproj = jax.random.normal(ks[3], (dim,), jnp.float32) * 0.05
    attention_biases = jax.random.normal(ks[4], (num_heads, num_offsets),
                                         jnp.float32) * 0.1
    x = jax.random.normal(ks[5], (batch, n, dim), jnp.float32)
    ln_w = 1.0 + 0.1 * jax.random.normal(ks[6], (dim,), jnp.float32)
    ln_b = 0.05 * jax.random.normal(ks[7], (dim,), jnp.float32)

    # one-time parameter preprocessing (hoisted out of the per-call path)
    params = prepare_params(ln_w, ln_b, wqkv, bqkv, attention_biases, idxs,
                            wproj, bproj, num_heads=num_heads, key_dim=key_dim,
                            d=d, scale=scale)
    params = jax.block_until_ready(params)

    out = attention_forward(x, *params, num_heads=num_heads, key_dim=key_dim,
                            d=d)
    out = jax.block_until_ready(out)

    ref = ref_forward(x, ln_w, ln_b, wqkv, bqkv, attention_biases, idxs, wproj,
                      bproj, num_heads=num_heads, key_dim=key_dim, d=d,
                      scale=scale)
    assert out.shape == (batch, n, dim)
    # bf16 matmul operands inside the kernel -> relaxed tolerance.
    assert jnp.allclose(out, ref, atol=2e-2, rtol=2e-2), "mismatch vs reference"

    print("KERNEL_OK")
</pallas_src>

<mosaic_0001>
module attributes {stable_mosaic.version = 11 : i64} {
  func.func @attention_kernel(%arg0: i32, %arg1: memref<1x16x32xf32, #tpu.memory_space<vmem>>, %arg2: memref<2x32xf32, #tpu.memory_space<vmem>>, %arg3: memref<32x96xbf16, #tpu.memory_space<vmem>>, %arg4: memref<1x96xf32, #tpu.memory_space<vmem>>, %arg5: memref<2x16x16xf32, #tpu.memory_space<vmem>>, %arg6: memref<64x32xbf16, #tpu.memory_space<vmem>>, %arg7: memref<1x32xf32, #tpu.memory_space<vmem>>, %arg8: memref<1x16x32xf32, #tpu.memory_space<vmem>>) attributes {dimension_semantics = [#tpu.dimension_semantics<parallel>], iteration_bounds = array<i64: 2>, scalar_prefetch = 0 : i64, scratch_operands = 0 : i64, tpu.core_type = #tpu.core_type<tc>, window_params = [{transform_indices = @transform_0, window_bounds = array<i64: 1, 16, 32>}, {pipeline_mode = #tpu.pipeline_mode<synchronous>, transform_indices = @transform_1, window_bounds = array<i64: 2, 32>}, {pipeline_mode = #tpu.pipeline_mode<synchronous>, transform_indices = @transform_2, window_bounds = array<i64: 32, 96>}, {pipeline_mode = #tpu.pipeline_mode<synchronous>, transform_indices = @transform_3, window_bounds = array<i64: 1, 96>}, {pipeline_mode = #tpu.pipeline_mode<synchronous>, transform_indices = @transform_4, window_bounds = array<i64: 2, 16, 16>}, {pipeline_mode = #tpu.pipeline_mode<synchronous>, transform_indices = @transform_5, window_bounds = array<i64: 64, 32>}, {pipeline_mode = #tpu.pipeline_mode<synchronous>, transform_indices = @transform_6, window_bounds = array<i64: 1, 32>}, {transform_indices = @transform_7, window_bounds = array<i64: 1, 16, 32>}]} {
    %c0 = arith.constant 0 : index
    %c0_0 = arith.constant 0 : index
    %c0_1 = arith.constant 0 : index
    %0 = vector.load %arg1[%c0, %c0_0, %c0_1] : memref<1x16x32xf32, #tpu.memory_space<vmem>>, vector<1x16x32xf32>
    %1 = vector.shape_cast %0 : vector<1x16x32xf32> to vector<16x32xf32>
    %cst = arith.constant dense<0.000000e+00> : vector<16xf32>
    %2 = vector.multi_reduction <add>, %1, %cst [1] : vector<16x32xf32> to vector<16xf32>
    %3 = vector.shape_cast %2 : vector<16xf32> to vector<16x1xf32>
    %cst_2 = arith.constant 3.200000e+01 : f32
    %4 = vector.broadcast %cst_2 : f32 to vector<16x1xf32>
    %5 = arith.divf %3, %4 : vector<16x1xf32>
    %6 = vector.broadcast %5 : vector<16x1xf32> to vector<16x32xf32>
    %7 = arith.subf %1, %6 : vector<16x32xf32>
    %8 = arith.mulf %7, %7 : vector<16x32xf32>
    %cst_3 = arith.constant dense<0.000000e+00> : vector<16xf32>
    %9 = vector.multi_reduction <add>, %8, %cst_3 [1] : vector<16x32xf32> to vector<16xf32>
    %10 = vector.shape_cast %9 : vector<16xf32> to vector<16x1xf32>
    %cst_4 = arith.constant 3.200000e+01 : f32
    %11 = vector.broadcast %cst_4 : f32 to vector<16x1xf32>
    %12 = arith.divf %10, %11 : vector<16x1xf32>
    %13 = vector.broadcast %5 : vector<16x1xf32> to vector<16x32xf32>
    %14 = arith.subf %1, %13 : vector<16x32xf32>
    %cst_5 = arith.constant 9.99999974E-6 : f32
    %15 = vector.broadcast %cst_5 : f32 to vector<16x1xf32>
    %16 = arith.addf %12, %15 : vector<16x1xf32>
    %17 = math.rsqrt %16 : vector<16x1xf32>
    %18 = vector.broadcast %17 : vector<16x1xf32> to vector<16x32xf32>
    %19 = arith.mulf %14, %18 : vector<16x32xf32>
    %c0_6 = arith.constant 0 : index
    %c0_7 = arith.constant 0 : index
    %20 = vector.load %arg2[%c0_6, %c0_7] : memref<2x32xf32, #tpu.memory_space<vmem>>, vector<1x32xf32>
    %21 = vector.broadcast %20 : vector<1x32xf32> to vector<16x32xf32>
    %22 = arith.mulf %19, %21 : vector<16x32xf32>
    %c1 = arith.constant 1 : index
    %c0_8 = arith.constant 0 : index
    %23 = vector.load %arg2[%c1, %c0_8] : memref<2x32xf32, #tpu.memory_space<vmem>>, vector<1x32xf32>
    %24 = vector.broadcast %23 : vector<1x32xf32> to vector<16x32xf32>
    %25 = arith.addf %22, %24 : vector<16x32xf32>
    %26 = arith.truncf %25 : vector<16x32xf32> to vector<16x32xbf16>
    %c0_9 = arith.constant 0 : index
    %c0_10 = arith.constant 0 : index
    %27 = vector.load %arg3[%c0_9, %c0_10] : memref<32x96xbf16, #tpu.memory_space<vmem>>, vector<32x96xbf16>
    %cst_11 = arith.constant dense<0.000000e+00> : vector<16x96xf32>
    %28 = tpu.matmul %26, %27, %cst_11 {dimension_numbers = #tpu.dot_dimension_numbers<[1], [0], [0], [1], [0, 0, 1, 1], [], []>} : vector<16x32xbf16>, vector<32x96xbf16>, vector<16x96xf32> -> vector<16x96xf32>
    %c0_12 = arith.constant 0 : index
    %c0_13 = arith.constant 0 : index
    %29 = vector.load %arg4[%c0_12, %c0_13] : memref<1x96xf32, #tpu.memory_space<vmem>>, vector<1x96xf32>
    %30 = vector.broadcast %29 : vector<1x96xf32> to vector<16x96xf32>
    %31 = arith.addf %28, %30 : vector<16x96xf32>
    %32 = vector.extract_strided_slice %31 {offsets = [0, 0], sizes = [16, 8], strides = [1, 1]} : vector<16x96xf32> to vector<16x8xf32>
    %33 = vector.extract_strided_slice %31 {offsets = [0, 8], sizes = [16, 8], strides = [1, 1]} : vector<16x96xf32> to vector<16x8xf32>
    %34 = vector.extract_strided_slice %31 {offsets = [0, 16], sizes = [16, 32], strides = [1, 1]} : vector<16x96xf32> to vector<16x32xf32>
    %35 = arith.truncf %32 : vector<16x8xf32> to vector<16x8xbf16>
    %36 = arith.truncf %33 : vector<16x8xf32> to vector<16x8xbf16>
    %37 = tpu.transpose %36, [1, 0] : vector<16x8xbf16> -> vector<8x16xbf16>
    %cst_14 = arith.constant dense<0.000000e+00> : vector<16x16xf32>
    %38 = tpu.matmul %35, %37, %cst_14 {dimension_numbers = #tpu.dot_dimension_numbers<[1], [0], [0], [1], [0, 0, 1, 1], [], []>} : vector<16x8xbf16>, vector<8x16xbf16>, vector<16x16xf32> -> vector<16x16xf32>
    %c0_15 = arith.constant 0 : index
    %c0_16 = arith.constant 0 : index
    %c0_17 = arith.constant 0 : index
    %39 = vector.load %arg5[%c0_15, %c0_16, %c0_17] : memref<2x16x16xf32, #tpu.memory_space<vmem>>, vector<1x16x16xf32>
    %40 = vector.shape_cast %39 : vector<1x16x16xf32> to vector<16x16xf32>
    %41 = arith.addf %38, %40 : vector<16x16xf32>
    %cst_18 = arith.constant dense<0xFF800000> : vector<16xf32>
    %42 = vector.multi_reduction <maximumf>, %41, %cst_18 [1] : vector<16x16xf32> to vector<16xf32>
    %43 = vector.shape_cast %42 : vector<16xf32> to vector<16x1xf32>
    %44 = vector.broadcast %43 : vector<16x1xf32> to vector<16x16xf32>
    %45 = arith.subf %41, %44 : vector<16x16xf32>
    %46 = math.exp %45 : vector<16x16xf32>
    %cst_19 = arith.constant dense<0.000000e+00> : vector<16xf32>
    %47 = vector.multi_reduction <add>, %46, %cst_19 [1] : vector<16x16xf32> to vector<16xf32>
    %48 = vector.shape_cast %47 : vector<16xf32> to vector<16x1xf32>
    %49 = vector.broadcast %48 : vector<16x1xf32> to vector<16x16xf32>
    %50 = arith.divf %46, %49 : vector<16x16xf32>
    %51 = arith.truncf %50 : vector<16x16xf32> to vector<16x16xbf16>
    %52 = arith.truncf %34 : vector<16x32xf32> to vector<16x32xbf16>
    %cst_20 = arith.constant dense<0.000000e+00> : vector<16x32xf32>
    %53 = tpu.matmul %51, %52, %cst_20 {dimension_numbers = #tpu.dot_dimension_numbers<[1], [0], [0], [1], [0, 0, 1, 1], [], []>} : vector<16x16xbf16>, vector<16x32xbf16>, vector<16x32xf32> -> vector<16x32xf32>
    %54 = vector.extract_strided_slice %31 {offsets = [0, 48], sizes = [16, 8], strides = [1, 1]} : vector<16x96xf32> to vector<16x8xf32>
    %55 = vector.extract_strided_slice %31 {offsets = [0, 56], sizes = [16, 8], strides = [1, 1]} : vector<16x96xf32> to vector<16x8xf32>
    %56 = vector.extract_strided_slice %31 {offsets = [0, 64], sizes = [16, 32], strides = [1, 1]} : vector<16x96xf32> to vector<16x32xf32>
    %57 = arith.truncf %54 : vector<16x8xf32> to vector<16x8xbf16>
    %58 = arith.truncf %55 : vector<16x8xf32> to vector<16x8xbf16>
    %59 = tpu.transpose %58, [1, 0] : vector<16x8xbf16> -> vector<8x16xbf16>
    %cst_21 = arith.constant dense<0.000000e+00> : vector<16x16xf32>
    %60 = tpu.matmul %57, %59, %cst_21 {dimension_numbers = #tpu.dot_dimension_numbers<[1], [0], [0], [1], [0, 0, 1, 1], [], []>} : vector<16x8xbf16>, vector<8x16xbf16>, vector<16x16xf32> -> vector<16x16xf32>
    %c1_22 = arith.constant 1 : index
    %c0_23 = arith.constant 0 : index
    %c0_24 = arith.constant 0 : index
    %61 = vector.load %arg5[%c1_22, %c0_23, %c0_24] : memref<2x16x16xf32, #tpu.memory_space<vmem>>, vector<1x16x16xf32>
    %62 = vector.shape_cast %61 : vector<1x16x16xf32> to vector<16x16xf32>
    %63 = arith.addf %60, %62 : vector<16x16xf32>
    %cst_25 = arith.constant dense<0xFF800000> : vector<16xf32>
    %64 = vector.multi_reduction <maximumf>, %63, %cst_25 [1] : vector<16x16xf32> to vector<16xf32>
    %65 = vector.shape_cast %64 : vector<16xf32> to vector<16x1xf32>
    %66 = vector.broadcast %65 : vector<16x1xf32> to vector<16x16xf32>
    %67 = arith.subf %63, %66 : vector<16x16xf32>
    %68 = math.exp %67 : vector<16x16xf32>
    %cst_26 = arith.constant dense<0.000000e+00> : vector<16xf32>
    %69 = vector.multi_reduction <add>, %68, %cst_26 [1] : vector<16x16xf32> to vector<16xf32>
    %70 = vector.shape_cast %69 : vector<16xf32> to vector<16x1xf32>
    %71 = vector.broadcast %70 : vector<16x1xf32> to vector<16x16xf32>
    %72 = arith.divf %68, %71 : vector<16x16xf32>
    %73 = arith.truncf %72 : vector<16x16xf32> to vector<16x16xbf16>
    %74 = arith.truncf %56 : vector<16x32xf32> to vector<16x32xbf16>
    %cst_27 = arith.constant dense<0.000000e+00> : vector<16x32xf32>
    %75 = tpu.matmul %73, %74, %cst_27 {dimension_numbers = #tpu.dot_dimension_numbers<[1], [0], [0], [1], [0, 0, 1, 1], [], []>} : vector<16x16xbf16>, vector<16x32xbf16>, vector<16x32xf32> -> vector<16x32xf32>
    %76 = tpu.concatenate %53, %75 in 1 : vector<16x32xf32>, vector<16x32xf32> -> vector<16x64xf32>
    %77 = arith.truncf %76 : vector<16x64xf32> to vector<16x64xbf16>
    %c0_28 = arith.constant 0 : index
    %c0_29 = arith.constant 0 : index
    %78 = vector.load %arg6[%c0_28, %c0_29] : memref<64x32xbf16, #tpu.memory_space<vmem>>, vector<64x32xbf16>
    %cst_30 = arith.constant dense<0.000000e+00> : vector<16x32xf32>
    %79 = tpu.matmul %77, %78, %cst_30 {dimension_numbers = #tpu.dot_dimension_numbers<[1], [0], [0], [1], [0, 0, 1, 1], [], []>} : vector<16x64xbf16>, vector<64x32xbf16>, vector<16x32xf32> -> vector<16x32xf32>
    %c0_31 = arith.constant 0 : index
    %c0_32 = arith.constant 0 : index
    %80 = vector.load %arg7[%c0_31, %c0_32] : memref<1x32xf32, #tpu.memory_space<vmem>>, vector<1x32xf32>
    %81 = vector.broadcast %80 : vector<1x32xf32> to vector<16x32xf32>
    %82 = arith.addf %79, %81 : vector<16x32xf32>
    %c0_33 = arith.constant 0 : index
    %c0_34 = arith.constant 0 : index
    %c0_35 = arith.constant 0 : index
    %83 = vector.load %arg8[%c0_33, %c0_34, %c0_35] : memref<1x16x32xf32, #tpu.memory_space<vmem>>, vector<1x16x32xf32>
    %84 = vector.shape_cast %83 : vector<1x16x32xf32> to vector<16x32xf32>
    %85 = vector.shape_cast %82 : vector<16x32xf32> to vector<1x16x32xf32>
    tpu.vector_store %arg8[%c0_33, %c0_34, %c0_35], %85 {strides = array<i32>} : memref<1x16x32xf32, #tpu.memory_space<vmem>>, vector<1x16x32xf32>,
    return
  }
  func.func @transform_0(%arg0: i32) -> (i32, i32, i32) {
    %c0_i32 = arith.constant 0 : i32
    %c0_i32_0 = arith.constant 0 : i32
    %c0_i32_1 = arith.constant 0 : i32
    return %arg0, %c0_i32, %c0_i32_0 : i32, i32, i32
  }
  func.func @transform_1(%arg0: i32) -> (i32, i32) {
    %c0_i32 = arith.constant 0 : i32
    %c0_i32_0 = arith.constant 0 : i32
    %c0_i32_1 = arith.constant 0 : i32
    return %c0_i32, %c0_i32_0 : i32, i32
  }
  func.func @transform_2(%arg0: i32) -> (i32, i32) {
    %c0_i32 = arith.constant 0 : i32
    %c0_i32_0 = arith.constant 0 : i32
    %c0_i32_1 = arith.constant 0 : i32
    return %c0_i32, %c0_i32_0 : i32, i32
  }
  func.func @transform_3(%arg0: i32) -> (i32, i32) {
    %c0_i32 = arith.constant 0 : i32
    %c0_i32_0 = arith.constant 0 : i32
    %c0_i32_1 = arith.constant 0 : i32
    return %c0_i32, %c0_i32_0 : i32, i32
  }
  func.func @transform_4(%arg0: i32) -> (i32, i32, i32) {
    %c0_i32 = arith.constant 0 : i32
    %c0_i32_0 = arith.constant 0 : i32
    %c0_i32_1 = arith.constant 0 : i32
    %c0_i32_2 = arith.constant 0 : i32
    return %c0_i32, %c0_i32_0, %c0_i32_1 : i32, i32, i32
  }
  func.func @transform_5(%arg0: i32) -> (i32, i32) {
    %c0_i32 = arith.constant 0 : i32
    %c0_i32_0 = arith.constant 0 : i32
    %c0_i32_1 = arith.constant 0 : i32
    return %c0_i32, %c0_i32_0 : i32, i32
  }
  func.func @transform_6(%arg0: i32) -> (i32, i32) {
    %c0_i32 = arith.constant 0 : i32
    %c0_i32_0 = arith.constant 0 : i32
    %c0_i32_1 = arith.constant 0 : i32
    return %c0_i32, %c0_i32_0 : i32, i32
  }
  func.func @transform_7(%arg0: i32) -> (i32, i32, i32) {
    %c0_i32 = arith.constant 0 : i32
    %c0_i32_0 = arith.constant 0 : i32
    %c0_i32_1 = arith.constant 0 : i32
    return %arg0, %c0_i32, %c0_i32_0 : i32, i32, i32
  }
}

</mosaic_0001>

<bundles_post_ra>
// kernel: attention_forward.1
= control target key start
LH: loop header
LB: loop body
LE: loop exit
PB: predicated region body
PF: predicated region fallthrough
CT: control target
= control target key end

     0   :  { %12 = vsyncpa [#allocation3], 0  ;;  %s1493_s0 = inlined_call_operand.vmem [shape: f32[2,16,32], index: 0, kind: input, shape index: {}]   ;;  %s1494_s1 = inlined_call_operand.vmem [shape: f32[2,32], index: 1, kind: input, shape index: {}]   ;;  %s1495_s2 = inlined_call_operand.vmem [shape: bf16[32,96], index: 2, kind: input, shape index: {}]   ;;  %s1496_s3 = inlined_call_operand.hbm [shape: f32[1,96], index: 3, kind: input, shape index: {}]   ;;  %s1497_s4 = inlined_call_operand.hbm [shape: f32[2,16,16], index: 4, kind: input, shape index: {}]   ;;  %s1498_s5 = inlined_call_operand.vmem [shape: bf16[64,32], index: 5, kind: input, shape index: {}]   ;;  %s1499_s6 = inlined_call_operand.vmem [shape: f32[1,32], index: 6, kind: input, shape index: {}]   ;;  %s1500_s7 = inlined_call_operand.hbm [shape: f32[2,16,32], index: 7, kind: output, shape index: {}]  }
   0x1   :  { %13 = vsyncpa [#allocation6], 0 }
   0x2   :  { %14 = vsyncpa [#allocation4], 0 }
   0x3   :  { %16 = vsyncpa [#allocation4 + $0x1], 0  ;;  %s1242_s24 = smov 0   ;;  %s1244_s25 = smov 0  }
   0x4   :  { %s1246_s26 = smov 0   ;;  %s1248_s27 = smov 0  }
   0x5 LB: > { %s1263_s28 = sadd.s32 4294967295, %s1185_s27   ;;  %s862_s29 = sadd.s32 4294967294, %s1185_s27   ;;  %s1185_s27 = sphi %s1248_s27, %s1518_s27   ;;  %s1181_s26 = sphi %s1246_s26, %s1517_s26   ;;  %s1177_s25 = sphi %s1244_s25, %s1516_s25   ;;  %s1173_s24 = sphi %s1242_s24, %s1515_s24  }
   0x6   : > { %s1267_s30 = sadd.s32 1, %s1185_s27   ;;  %s181_s8 = sadd.s32 1, %s1181_s26 }
   0x7   : > { %s178_s9 = ssub.s32 %s1185_s27, %s1267_s30  ;;  %p191_p0 = scmp.ne.s32.totalorder %s1181_s26, %s1177_s25 }
   0x8   : > { %p179_p1 = scmp.eq.s32.totalorder %s178_s9, 0  ;;  %p192_p2 = scmp.eq.s32.totalorder %s1263_s28, 1 }
   0x9   : > { %p197_p3 = scmp.ne.s32.totalorder %s1177_s25, %s1173_s24  ;;  %p198_p4 = scmp.eq.s32.totalorder %s862_s29, 1 }
   0xa   : > { %s1278_s10 = scalar_select %p179_p1, %s1181_s26, %s181_s8  }
   0xb   : > { %p1280_p5 = por %p192_p2, %p191_p0  ;;  %p1284_p6 = por %p198_p4, %p197_p3 }
   0xc   : > { %p863_p7 = scmp.ge.s32.totalorder %s1185_s27, 1  ;;  %p205_p8 = scmp.lt.s32.totalorder %s1185_s27, 3 }
   0xd   : > { %s1504_s11 = scalar_select %p1280_p5, 1, 0 }
   0xe   : > { %s1505_s12 = scalar_select %p1284_p6, 1, 0 }
   0xf   : > { %p1501_p9 = scmp.eq.s32.totalorder %s1263_s28, 0  ;;  %p1291_p10 = pnand %p863_p7, %p205_p8 }
  0x10   : > { %s1187_s14 = smov [#allocation2]   ;;  %s1188_s16 = smov [#allocation5]  }
  0x11   : > { %s1506_s13 = scalar_select %p1291_p10, 1, 0 }
  0x12   : > { %s224_s15 = sshll.u32 %s1187_s14, 4  ;;  %p966_p11 = pneg %p1291_p10  ;;  %s225_s15 = int_to_ptr.vmem [resolvable:$true] %s224_s15 }
  0x13   : > { %s234_s17 = sshll.u32 %s1188_s16, 4  ;;  %s1059_s21 = scalar_lea.hbm %s1496_s3, 16  ;;  %s1303_s17 = int_to_ptr.vmem [resolvable:$true] %s234_s17 }
  0x14   : > { %p1299_p12 = pnand %p1501_p9, %p966_p11  ;;  %p1060_p13 = scmp.ne.s32.totalorder %s1496_s3, %s1059_s21 }
  0x15   : > { %p1066_p3 = scmp.lt.u32.totalorder %s1059_s21, %s1496_s3 }
  0x16   : > { %p1061_p0 = pneg %p1299_p12 }
  0x18   : > { %p1062_p1 = pnand %p1061_p0, %p1060_p13 }
  0x1a   : > { %p1063_p2 = pneg %p1062_p1 }
  0x1c   : > { %p1068_p4 = pnand %p1066_p3, %p1063_p2 }
  0x1e   : > { %1071 = shalt.err (!%p1068_p4)
}
  0x1f   : > { %s1072_s9 = scalar_lea.vmem %s225_s15, 16  ;;  %s1079_s14 = scalar_lea.vmem %s225_s15, 32 }
  0x20   : > { %p1073_p7 = scmp.ne.s32.totalorder %s225_s15, %s1072_s9  ;;  %p1080_p9 = scmp.lt.s32.totalorder %s225_s15, %s225_s15 }
  0x21   : > { %p1081_p6 = scmp.lt.s32.totalorder %s1079_s14, %s1072_s9 }
  0x22   : > { %p1075_p8 = pnand %p1073_p7, %p1061_p0 }
  0x23   : > { %p1082_p5 = por %p1081_p6, %p1080_p9 }
  0x24   : > { %p1076_p11 = pneg %p1075_p8 }
  0x26   : > { %p1083_p10 = pnand %p1082_p5, %p1076_p11 }
  0x28   : > { %1086 = shalt.err (!%p1083_p10)
}
  0x29   : > { %969 = dma.hbm_to_vmem [thread:$0]  (!%p1299_p12), %s1496_s3, 16, %s225_s15, [#allocation3]  }
  0x2a   : > { %s1087_s22 = scalar_lea.hbm %s1497_s4, 512 }
  0x2b   : > { %p1088_p13 = scmp.ne.s32.totalorder %s1497_s4, %s1087_s22  ;;  %p1094_p9 = scmp.lt.u32.totalorder %s1087_s22, %s1497_s4 }
  0x2d   : > { %p1090_p6 = pnand %p1088_p13, %p1061_p0 }
  0x2f   : > { %p1091_p5 = pneg %p1090_p6 }
  0x31   : > { %p1096_p10 = pnand %p1094_p9, %p1091_p5 }
  0x33   : > { %1099 = shalt.err (!%p1096_p10)
}
  0x34   : > { %s1100_s15 = scalar_lea.vmem %s1303_s17, 512  ;;  %p1108_p4 = scmp.lt.s32.totalorder %s1303_s17, %s1303_s17 }
  0x35   : > { %p1101_p1 = scmp.ne.s32.totalorder %s1303_s17, %s1100_s15  ;;  %p1109_p7 = scmp.lt.s32.totalorder %s1100_s15, %s1100_s15 }
  0x37   : > { %p1103_p2 = pnand %p1101_p1, %p1061_p0  ;;  %p1110_p8 = por %p1109_p7, %p1108_p4 }
  0x39   : > { %p1104_p3 = pneg %p1103_p2 }
  0x3b   : > { %p1111_p11 = pnand %p1110_p8, %p1104_p3 }
  0x3d   : > { %1114 = shalt.err (!%p1111_p11)
}
  0x3e   : > { %s1189_s14 = smov 128   ;;  %s1190_s16 = smov 8  }
  0x3f   : > { %972 = dma.hbm_to_vmem [thread:$0]  (!%p1299_p12), %s1497_s4, 512, %s1303_s17, [#allocation6], %s1189_s14, %s1189_s14, %s1190_s16  }
  0x40   : > { %p1508_p13 = scmp.ne.s32.totalorder %s1506_s13, 0 }
  0x41   : > { %p1509_p0 = scmp.eq.s32.totalorder (!%p1508_p13), %s1263_s28, 0 }
  0x42   : > { %264 = sbr.rel (%p1508_p13) target bundleno = 1853 (0x73d), region = 48 }
  0x49   : > { %1160 = dma.done.wait (%p1509_p0), [#allocation3], 16   ;;  %p1510_p6 = pmov %p1509_p0 }
  0x4a   : > { %p1511_p5 = pmov %p1509_p0 }
  0x4b   : > { %1162 = vsyncadd (%p1510_p6), [#allocation3], 4294967280 }
  0x4c   : > { %1164 = dma.done.wait (%p1511_p5), [#allocation6], 512   ;;  %p1512_p9 = pmov %p1509_p0 }
  0x4d   : > { %p300_p10 = scmp.lt.s32.totalorder %s1263_s28, 1  ;;  %vm308_vm0 = vcmask 261120   ;;  %v1033_v14 = vld [vmem:[%s1495_s2] sm:$0xff]   ;;  %v1191_v15 = vmov 0.0   ;;  %v1034_v16 = vld [vmem:[%s1495_s2 + $0x8] sm:$0xff]   ;;  %vm1192_vm1 = vmmov 0  }
  0x4e   : > { %1166 = vsyncadd (%p1512_p9), [#allocation6], 4294966784  ;;  %912 = vmatprep.subr.bf16.mxu0 %v1191_v15  ;;  %920 = vmatprep.subr.bf16.mxu1 %v1191_v15  ;;  %v873_v25 = vld [vmem:[%s1494_s1] ss:$0 sm:$0xff]  ;;  %v874_v29 = vld [vmem:[%s1494_s1 + $0x1] ss:$0 sm:$0xff] }
  0x4f   : > { %s301_s18 = scalar_select %p300_p10, %s1263_s28, 1  ;;  %913 = vmatpush3.bf16.msra.mxu0 %v1033_v14  ;;  %916 = vmatprep.mubr.msk.bf16.mxu0 %vm1192_vm1, %v1191_v15  ;;  %v875_v34 = vld [vmem:[#allocation2] ss:$0 sm:$0xff]  ;;  %vm424_vm2 = vcmask 64512   ;;  %v419_v47 = vld [vmem:[#allocation5] sm:$0xff]  ;;  %v420_v49 = vld [vmem:[#allocation5 + $0x8] sm:$0xff] }
  0x50   : > { %914 = vmatprep.subr.bf16.mxu0 %v1191_v15  ;;  %922 = vmatprep.mubr.msk.bf16.mxu1 %vm1192_vm1, %v1191_v15  ;;  %s1193_s20 = smov 72   ;;  %vm472_vm3 = vcmask 130048   ;;  %v544_v57 = vld [vmem:[#allocation5 + $0x10] sm:$0xff]  ;;  %v545_v59 = vld [vmem:[#allocation5 + $0x18] sm:$0xff]  ;;  %s1196_s21 = smov 112   ;;  %vm717_vm4 = vcmask 523264  }
  0x51   : > { %s894_s17 = sshll.u32 %s301_s18, 4  ;;  %s1194_s18 = smov 120  }
  0x52   : > { %s304_s22 = scalar_lea.vmem %s1493_s0, %s894_s17  ;;  %s1195_s17 = smov 80  }
  0x53   : > { %v306_v0 = vld [vmem:[%s304_s22] sm:$0xff]  ;;  %v307_v1 = vld [vmem:[%s304_s22 + $0x8] sm:$0xff]  ;;  %915 = vmatpush3.bf16.msra.mxu0 %v1034_v16  ;;  %s1197_s13 = smov 64   ;;  %s1198_s19 = smov 32  }
  0x54   : > { %v309_v2 = vsel %vm308_vm0, %v306_v0, 0.0  ;;  %v312_v3 = vsel %vm308_vm0, %v307_v1, 0.0  ;;  %926 = vmatprep.subr.bf16.mxu0 %v1191_v15  ;;  %s895_s23 = sshll.u32 %s1263_s28, 8  ;;  %p1513_p1 = scmp.ne.s32.totalorder %s1504_s11, 0 }
  0x55   : > { %310 = vadd.xlane.f32.xlu0 %v309_v2  ;;  %s1449_s9 = scalar_lea.hbm %s1500_s7, %s895_s23  ;;  %s1199_s14 = smov [#allocation7]  }
  0x56   : > { %s1119_s16 = sshll.u32 %s1199_s14, 4  ;;  %s1120_s16 = int_to_ptr.vmem [resolvable:$false] %s1119_s16 }
  0x59   : > { %313 = vadd.xlane.f32.xlu0 %v312_v3 }
  0xe2   : > { %v311_v4 = vpop.xlane.xlu0 %310 }
  0xe3   : > { %v316_v5 = vmul.f32 0.03125, %v311_v4 }
  0xe5   : > { %v318_v6 = vsub.f32 %v306_v0, %v316_v5 }
  0xe6   : > { %v314_v7 = vpop.xlane.xlu0 %313 }
  0xe7   : > { %v317_v8 = vmul.f32 0.03125, %v314_v7  ;;  %v320_v9 = vmul.f32 %v318_v6, %v318_v6 }
  0xe9   : > { %v319_v10 = vsub.f32 %v307_v1, %v317_v8  ;;  %v322_v11 = vsel %vm308_vm0, %v320_v9, 0.0 }
  0xea   : > { %323 = vadd.xlane.f32.xlu1 %v322_v11 }
  0xeb   : > { %v321_v12 = vmul.f32 %v319_v10, %v319_v10 }
  0xed   : > { %v325_v13 = vsel %vm308_vm0, %v321_v12, 0.0 }
  0xee   : > { %326 = vadd.xlane.f32.xlu1 %v325_v13 }
 0x177   : > { %v324_v17 = vpop.xlane.xlu1 %323 }
 0x178   : > { %v328_v18 = vmul.f32 0.03125, %v324_v17 }
 0x17a   : > { %v330_v19 = vadd.f32 1e-05, %v328_v18 }
 0x17b   : > { %v327_v20 = vpop.xlane.xlu1 %326 }
 0x17c   : > { %1039 = vrsqrt.f32 %v330_v19  ;;  %v329_v21 = vmul.f32 0.03125, %v327_v20 }
 0x17e   : > { %v331_v22 = vadd.f32 1e-05, %v329_v21 }
 0x180   : > { %1041 = vrsqrt.f32 %v331_v22 }
 0x186   : > { %v1040_v23 = vpop.eup %1039 }
 0x187   : > { %v334_v24 = vmul.f32 %v1040_v23, %v318_v6 }
 0x189   : > { %v341_v28 = vmul.f32 %v873_v25, %v334_v24 }
 0x18a   : > { %v1042_v26 = vpop.eup %1041 }
 0x18b   : > { %v335_v27 = vmul.f32 %v1042_v26, %v319_v10  ;;  %v348_v31 = vadd.f32 %v874_v29, %v341_v28 }
 0x18d   : > { %v342_v30 = vmul.f32 %v873_v25, %v335_v27 }
 0x18f   : > { %v349_v32 = vadd.f32 %v874_v29, %v342_v30 }
 0x191   : > { %v350_v33 = vpack.c.bf16 %v349_v32, %v348_v31 }
 0x193   : > { %917 = vmatmul.mubr.msk.bf16.vlgmr.msra.gmra.mrb[0].mxu0 %vm308_vm0, %v350_v33 }
 0x194   : > { %928 = vmatprep.mubr.msk.bf16.mxu0 %vm1192_vm1, %v1191_v15 }
 0x266   : > { %v411_v35 = vpop.f32.mrb[0].mxu0 }
 0x267   : > { %v918_v36 = vpop.f32.mrb[1].mxu0  ;;  %v412_v38 = vadd.f32 %v875_v34, %v411_v35 }
 0x268   : > { %v414_v37 = vpop.f32.mrb[2].mxu0 }
 0x269   : > { %v415_v39 = vadd.f32 %v875_v34, %v414_v37  ;;  %v919_v40 = vpop.f32.mrb[3].mxu0 }
 0x26a   : > { %v1035_v40 = vld [vmem:[%s1498_s5] sm:$0xff]  }
 0x26b   : > { %v1394_v41 = vpack.c.bf16 %v415_v39, %v412_v38 }
 0x26d   : > { %548 = vrot.lane.b32.xlu1 %v1394_v41, %s1193_s20  ;;  %422 = vrot.lane.b32.xlu0 %v1394_v41, %s1194_s18  ;;  %s297_s20 = sand.u32 1, %s1177_s25  }
 0x26e   : > { %s870_s18 = sshll.u32 %s297_s20, 4  ;;  %s1452_s28 = scalar_lea.sflag [#allocation4], %s297_s20 }
 0x271   : > { %546 = vrot.lane.b32.xlu1 %v1394_v41, %s1195_s17 }
 0x2df   : > { %v423_v42 = vpop.permute.xlu0 %422  ;;  %v549_v44 = vpop.permute.xlu1 %548 }
 0x2e0   : > { %v429_v43 = vsel %vm424_vm2, %v423_v42, 0  ;;  %v554_v45 = vsel %vm424_vm2, %v549_v44, 0  ;;  %v1037_v42 = vld [vmem:[%s1498_s5 + $0x10] sm:$0xff]  }
 0x2e1   : > { %921 = vmatpush3.bf16.xpose.msra.mxu1 %v429_v43 }
 0x2e2   : > { %932 = vmatprep.subr.bf16.mxu1 %v1191_v15 }
 0x2e3   : > { %v547_v46 = vpop.permute.xlu1 %546 }
 0x2e8   : > { %923 = vmatmul.mubr.msk.bf16.vlgmr.msra.gmra.mrb[0].mxu1 %vm424_vm2, %v1394_v41 }
 0x2e9   : > { %933 = vmatpush3.bf16.xpose.msra.mxu1 %v554_v45  ;;  %934 = vmatprep.mubr.msk.bf16.mxu1 %vm1192_vm1, %v1191_v15 }
 0x2ea   : > { %944 = vmatprep.subr.bf16.mxu1 %v1191_v15 }
 0x2f0   : > { %935 = vmatmul.mubr.msk.bf16.vlgmr.msra.gmra.mrb[4].mxu1 %vm424_vm2, %v547_v46 }
 0x2f1   : > { %952 = vmatprep.mubr.msk.bf16.mxu1 %vm1192_vm1, %v1191_v15  ;;  %945 = vmatpush3.bf16.msra.mxu1 %v1035_v40 }
 0x2f2   : > { %946 = vmatprep.subr.bf16.mxu1 %v1191_v15 }
 0x3bb   : > { %v465_v48 = vpop.f32.mrb[0].mxu1 }
 0x3bc   : > { %v466_v50 = vadd.f32 %v465_v48, %v419_v47  ;;  %v924_v51 = vpop.f32.mrb[1].mxu1  ;;  %v1038_v47 = vld [vmem:[%s1498_s5 + $0x18] sm:$0xff]  }
 0x3bd   : > { %v468_v52 = vpop.f32.mrb[2].mxu1 }
 0x3be   : > { %v469_v53 = vadd.f32 %v468_v52, %v420_v49  ;;  %v925_v54 = vpop.f32.mrb[3].mxu1  ;;  %v473_v55 = vsel %vm472_vm3, %v466_v50, -inf }
 0x3bf   : > { %474 = vmax.xlane.f32.xlu1 %v473_v55 }
 0x3c0   : > { %v476_v56 = vsel %vm472_vm3, %v469_v53, -inf }
 0x3c1   : > { %477 = vmax.xlane.f32.xlu0 %v476_v56 }
 0x3c3   : > { %v590_v58 = vpop.f32.mrb[4].mxu1 }
 0x3c4   : > { %v591_v60 = vadd.f32 %v590_v58, %v544_v57  ;;  %v936_v61 = vpop.f32.mrb[5].mxu1  ;;  %v883_v58 = vld [vmem:[%s1499_s6] ss:$0 sm:$0xff] }
 0x3c5   : > { %v593_v62 = vpop.f32.mrb[6].mxu1 }
 0x3c6   : > { %v594_v63 = vadd.f32 %v593_v62, %v545_v59  ;;  %v937_v0 = vpop.f32.mrb[7].mxu1  ;;  %v597_v1 = vsel %vm472_vm3, %v591_v60, -inf }
 0x3c7   : > { %598 = vmax.xlane.f32.xlu0 %v597_v1 }
 0x3c8   : > { %v600_v2 = vsel %vm472_vm3, %v594_v63, -inf }
 0x3cb   : > { %601 = vmax.xlane.f32.xlu0 %v600_v2 }
 0x44c   : > { %v475_v3 = vpop.xlane.xlu1 %474 }
 0x44d   : > { %v479_v4 = vsub.f32 %v466_v50, %v475_v3 }
 0x44e   : > { %v478_v5 = vpop.xlane.xlu0 %477 }
 0x44f   : > { %v481_v6 = vmul.f32 1.442695, %v479_v4  ;;  %v480_v7 = vsub.f32 %v469_v53, %v478_v5 }
 0x451   : > { %1043 = vpow2.f32 %v481_v6  ;;  %v483_v8 = vmul.f32 1.442695, %v480_v7 }
 0x453   : > { %1045 = vpow2.f32 %v483_v8 }
 0x454   : > { %v599_v9 = vpop.xlane.xlu0 %598 }
 0x455   : > { %v603_v10 = vsub.f32 %v591_v60, %v599_v9 }
 0x457   : > { %v605_v11 = vmul.f32 1.442695, %v603_v10 }
 0x458   : > { %v602_v12 = vpop.xlane.xlu0 %601 }
 0x459   : > { %1047 = vpow2.f32 %v605_v11  ;;  %v604_v13 = vsub.f32 %v594_v63, %v602_v12 }
 0x45b   : > { %v1044_v14 = vpop.eup %1043  ;;  %v607_v16 = vmul.f32 1.442695, %v604_v13 }
 0x45c   : > { %v485_v17 = vsel %vm472_vm3, %v1044_v14, 0.0 }
 0x45d   : > { %v1046_v18 = vpop.eup %1045  ;;  %1049 = vpow2.f32 %v607_v16  ;;  %486 = vadd.xlane.f32.xlu1 %v485_v17 }
 0x45e   : > { %v488_v19 = vsel %vm472_vm3, %v1046_v18, 0.0 }
 0x45f   : > { %489 = vadd.xlane.f32.xlu0 %v488_v19 }
 0x463   : > { %v1048_v20 = vpop.eup %1047 }
 0x464   : > { %v609_v21 = vsel %vm472_vm3, %v1048_v20, 0.0 }
 0x465   : > { %610 = vadd.xlane.f32.xlu1 %v609_v21 }
 0x467   : > { %v1050_v22 = vpop.eup %1049 }
 0x468   : > { %v612_v23 = vsel %vm472_vm3, %v1050_v22, 0.0 }
 0x469   : > { %613 = vadd.xlane.f32.xlu0 %v612_v23 }
 0x476   : > { %496 = vrot.lane.b32.xlu1 %v1394_v41, %s1196_s21 }
 0x47f   : > { %620 = vrot.lane.b32.xlu0 %v1394_v41, %s1197_s13  ;;  %v1036_v41 = vld [vmem:[%s1498_s5 + $0x8] sm:$0xff]   ;;  %s299_s13 = scalar_lea.vmem [#allocation7], %s870_s18 }
 0x480   : > { %947 = vmatpush3.bf16.msra.mxu1 %v1036_v41  ;;  %s778_s22 = sshll.u32 %s299_s13, 4  ;;  %s1443_s22 = int_to_ptr.vmem [resolvable:$true] %s778_s22 }
 0x481   : > { %948 = vmatprep.subr.bf16.mxu1 %v1191_v15  ;;  %s1115_s15 = scalar_lea.vmem %s1443_s22, 256  ;;  %p1122_p4 = scmp.lt.s32.totalorder %s1443_s22, %s1120_s16 }
 0x482   : > { %p1116_p12 = scmp.ne.s32.totalorder %s1443_s22, %s1115_s15 }
 0x484   : > { %949 = vmatpush3.bf16.msra.mxu1 %v1037_v42  ;;  %p1117_p2 = pnand %p1116_p12, %p1513_p1 }
 0x485   : > { %950 = vmatprep.subr.bf16.mxu1 %v1191_v15 }
 0x486   : > { %p1118_p3 = pneg %p1117_p2 }
 0x488   : > { %951 = vmatpush3.bf16.msra.mxu1 %v1038_v47 }
 0x4ea   : > { %v487_v24 = vpop.xlane.xlu1 %486 }
 0x4eb   : > { %1051 = vrcp.f32 %v487_v24 }
 0x4ec   : > { %v490_v25 = vpop.xlane.xlu0 %489 }
 0x4ed   : > { %1053 = vrcp.f32 %v490_v25 }
 0x4f2   : > { %v611_v26 = vpop.xlane.xlu1 %610 }
 0x4f3   : > { %1055 = vrcp.f32 %v611_v26 }
 0x4f5   : > { %v1052_v27 = vpop.eup %1051 }
 0x4f6   : > { %v497_v28 = vpop.permute.xlu1 %496  ;;  %v614_v29 = vpop.xlane.xlu0 %613  ;;  %v492_v31 = vmul.f32 %v1052_v27, %v1044_v14 }
 0x4f7   : > { %v1054_v30 = vpop.eup %1053  ;;  %1057 = vrcp.f32 %v614_v29  ;;  %927 = vmatpush3.bf16.msra.mxu0 %v497_v28 }
 0x4f8   : > { %v494_v32 = vmul.f32 %v1054_v30, %v1046_v18  ;;  %938 = vmatprep.subr.bf16.mxu0 %v1191_v15 }
 0x4fa   : > { %v621_v33 = vpop.permute.xlu0 %620  ;;  %v495_v34 = vpack.c.bf16 %v494_v32, %v492_v31 }
 0x4fc   : > { %929 = vmatmul.mubr.msk.bf16.vlgmr.msra.gmra.mrb[4].mxu0 %vm472_vm3, %v495_v34 }
 0x4fd   : > { %939 = vmatpush3.bf16.msra.mxu0 %v621_v33  ;;  %940 = vmatprep.mubr.msk.bf16.mxu0 %vm1192_vm1, %v1191_v15  ;;  %v1056_v35 = vpop.eup %1055 }
 0x4fe   : > { %v616_v37 = vmul.f32 %v1056_v35, %v1048_v20 }
 0x501   : > { %v1058_v36 = vpop.eup %1057 }
 0x502   : > { %v618_v38 = vmul.f32 %v1058_v36, %v1050_v22 }
 0x504   : > { %v619_v39 = vpack.c.bf16 %v618_v38, %v616_v37 }
 0x506   : > { %941 = vmatmul.mubr.msk.bf16.vlgmr.msra.gmra.mrb[8].mxu0 %vm472_vm3, %v619_v39 }
 0x5cf   : > { %v536_v43 = vpop.f32.mrb[4].mxu0 }
 0x5d0   : > { %v930_v44 = vpop.f32.mrb[5].mxu0 }
 0x5d1   : > { %v539_v45 = vpop.f32.mrb[6].mxu0 }
 0x5d2   : > { %v931_v46 = vpop.f32.mrb[7].mxu0 }
 0x5d9   : > { %v660_v48 = vpop.f32.mrb[8].mxu0 }
 0x5da   : > { %v942_v49 = vpop.f32.mrb[9].mxu0 }
 0x5db   : > { %v663_v50 = vpop.f32.mrb[10].mxu0 }
 0x5dc   : > { %v1028_v51 = vpack.i.bf16 %v663_v50, %v660_v48  ;;  %v943_v52 = vpop.f32.mrb[11].mxu0 }
 0x5de   : > { %1029 = vrot.lane.b32.xlu1 %v1028_v51, %s1198_s19  ;;  %s1121_s19 = scalar_lea.vmem %s1120_s16, 512 }
 0x5df   : > { %p1123_p7 = scmp.lt.s32.totalorder %s1121_s19, %s1115_s15 }
 0x5e1   : > { %p1124_p8 = por %p1123_p7, %p1122_p4 }
 0x5e3   : > { %p1125_p11 = pnand %p1124_p8, %p1118_p3 }
 0x650   : > { %v1030_v53 = vpop.permute.xlu1 %1029 }
 0x651   : > { %v1032_v15 = vunpack.i.h.bf16 %v1030_v53  ;;  %v1031_v54 = vunpack.i.l.bf16 %v1030_v53 }
 0x653   : > { %v676_v55 = vsel %vm308_vm0, %v539_v45, %v1032_v15  ;;  %v675_v56 = vsel %vm308_vm0, %v536_v43, %v1031_v54 }
 0x654   : > { %v677_v57 = vpack.c.bf16 %v676_v55, %v675_v56 }
 0x656   : > { %953 = vmatmul.mubr.msk.bf16.vlgmr.msra.gmra.mrb[8].mxu1 %vm717_vm4, %v677_v57 }
 0x729   : > { %v755_v59 = vpop.f32.mrb[8].mxu1 }
 0x72a   : > { %v756_v60 = vadd.f32 %v883_v58, %v755_v59  ;;  %v954_v61 = vpop.f32.mrb[9].mxu1 }
 0x72b   : > { %v758_v62 = vpop.f32.mrb[10].mxu1 }
 0x72c   : > { %762 = vst.msk [vmem:[%s299_s13] sm:$0xff] %vm308_vm0, %v756_v60  ;;  %v759_v63 = vadd.f32 %v883_v58, %v758_v62  ;;  %v955_v0 = vpop.f32.mrb[11].mxu1 }
 0x72e   : > { %763 = vst.msk [vmem:[%s299_s13 + $0x8] sm:$0xff] %vm308_vm0, %v759_v63 }
 0x72f   : > { %1128 = shalt.err (!%p1125_p11)
}
 0x730   : > { %s1129_s20 = scalar_lea.hbm %s1449_s9, 256  ;;  %s1133_s21 = scalar_lea.hbm %s1500_s7, 512 }
 0x731   : > { %p1130_p13 = scmp.ne.s32.totalorder %s1449_s9, %s1129_s20  ;;  %p1134_p5 = scmp.lt.u32.totalorder %s1449_s9, %s1500_s7 }
 0x732   : > { %p1135_p9 = scmp.lt.u32.totalorder %s1133_s21, %s1129_s20  ;;  %p1137_p12 = scmp.lt.u32.totalorder %s1129_s20, %s1449_s9 }
 0x733   : > { %p1131_p0 = pnand %p1130_p13, %p1513_p1 }
 0x734   : > { %p1136_p10 = por %p1135_p9, %p1134_p5 }
 0x735   : > { %p1132_p6 = pneg %p1131_p0 }
 0x736   : > { %p1138_p2 = por %p1137_p12, %p1136_p10 }
 0x738   : > { %p1139_p3 = pnand %p1138_p2, %p1132_p6 }
 0x73a   : > { %1142 = shalt.err (!%p1139_p3)
}
 0x73b   : > { %s1200_s29 = smov 128   ;;  %s1201_s8 = smov 8  }
 0x73c   : > { %964 = dma.vmem_to_hbm [thread:$0]  (%p1513_p1), %s1443_s22, 256, %s1449_s9, %s1452_s28, %s1200_s29, %s1200_s29, %s1201_s8  }
 0x73d PF: > { %p981_p4 = scmp.ge.s32.totalorder %s1185_s27, 2  ;;  %s793_s15 = sand.u32 1, %s1173_s24  }
 0x73e   : > { %p1514_p7 = scmp.ne.s32.totalorder %s1505_s12, 0  ;;  %s794_s14 = scalar_lea.sflag [#allocation4], %s793_s15 }
 0x740   : > { %p974_p8 = pnand %p981_p4, %p1514_p7 }
 0x742   : > { %1168 = dma.done.wait (!%p974_p8), %s794_s14, 256  }
 0x743   : > { %1170 = vsyncadd (!%p974_p8), %s794_s14, 4294967040  ;;  %p19_p11 = scmp.ge.s32.totalorder %s1267_s30, 4   ;;  %s1515_s24 = smov %s1177_s25 }
 0x744   : > { %s1516_s25 = smov %s1181_s26  ;;  %s1517_s26 = smov %s1278_s10 }
 0x745   : > { %s1518_s27 = smov %s1267_s30  ;;  %21 = sbr.rel (!%p19_p11) target bundleno = 5 (0x5), region = 93 }
 0x74c   :  { %799 = vsyncpa [#allocation3], 1 }
 0x74d   :  { %801 = vsyncpa [#allocation3 + $0x1], 1 }
 0x74e   :  { %802 = vsyncpa [#allocation6], 1 }
 0x74f   :  { %803 = vsyncpa [#allocation4], 1 }
 0x750   :  { %805 = vsyncpa [#allocation4 + $0x1], 1 }

</bundles_post_ra>
